<compile_context>
chip_gen: v5e
topology: v5e:2x2
jax: 0.10.0
libtpu: 0.0.40
codegen_flags: <defaults>
</compile_context>

<pallas_src>
import functools

import jax
import jax.numpy as jnp
import numpy as np
from jax.experimental import pallas as pl
from jax.experimental.pallas import tpu as pltpu


# ~2 MiB input blocks: big enough to reach ~85% of HBM roofline, small enough
# that a double-buffered tile fits v5e's 16 MiB default scoped VMEM and v7x's
# 64 MiB physical VMEM without touching vmem_limit_bytes.
_TARGET_BLOCK_BYTES = 2 * 1024 * 1024


def _largest_divisor_leq(n: int, cap: int) -> int:
    cap = max(1, min(n, cap))
    for d in range(cap, 0, -1):
        if n % d == 0:
            return d
    return 1


def _largest_mult8_divisor_leq(n: int, cap: int):
    d = (min(n, cap) // 8) * 8
    while d >= 8:
        if n % d == 0:
            return d
        d -= 8
    return None


def _largest_mult128_divisor_leq(n: int, cap: int):
    d = (min(n, cap) // 128) * 128
    while d >= 128:
        if n % d == 0:
            return d
        d -= 128
    return None


def _acc_dtype(dtype):
    # f32 accumulation for all float inputs (bf16/fp16/f32); ints keep dtype.
    if jnp.issubdtype(dtype, jnp.floating):
        return jnp.float32
    return dtype


def _init_value(function: str, acc_dt):
    if function in ("sum", "mean"):
        return 0
    if jnp.issubdtype(acc_dt, jnp.floating):
        return float("inf") if function == "min" else float("-inf")
    info = jnp.iinfo(acc_dt)
    return info.max if function == "min" else info.min


# --------------------------------------------------------------------------- #
# Kernel factories                                                             #
# --------------------------------------------------------------------------- #
def _reduce(x, function, axis, keepdims=True):
    if function in ("sum", "mean"):
        return jnp.sum(x, axis=axis, keepdims=keepdims)
    if function == "min":
        return jnp.min(x, axis=axis, keepdims=keepdims)
    return jnp.max(x, axis=axis, keepdims=keepdims)


def _combine(acc, part, function):
    if function in ("sum", "mean"):
        return acc + part
    if function == "min":
        return jnp.minimum(acc, part)
    return jnp.maximum(acc, part)


def _make_sublane_direct_kernel(function: str, inv_r: float, acc_dt):
    """Reduce axis 1 of a (TB, R, TL) tile in one shot (no accumulator)."""

    def kernel(x_ref, o_ref):
        x = x_ref[...].astype(acc_dt)
        res = _reduce(x, function, axis=1)
        if function == "mean":
            res = res * inv_r
        o_ref[...] = res.astype(o_ref.dtype)

    return kernel


def _make_sublane_acc_kernel(function: str, inv_r: float, init_val):
    """Reduce axis 1 of a (TB, TR, TL) tile into a resident (TB, 1, TL) acc.

    The reduction grid axis (index 2) is innermost/'arbitrary'; a VMEM scratch
    accumulator carries partial results across it.
    """

    def kernel(x_ref, o_ref, acc_ref):
        r = pl.program_id(2)

        @pl.when(r == 0)
        def _():
            acc_ref[...] = jnp.full(acc_ref.shape, init_val, acc_ref.dtype)

        x = x_ref[...].astype(acc_ref.dtype)
        acc_ref[...] = _combine(acc_ref[...], _reduce(x, function, axis=1),
                                function)

        @pl.when(r == pl.num_programs(2) - 1)
        def _():
            res = acc_ref[...]
            if function == "mean":
                res = res * inv_r  # single multiply; 1/R is a compile-time const
            o_ref[...] = res.astype(o_ref.dtype)

    return kernel


def _make_lane_direct_kernel(function: str, inv_r: float, acc_dt):
    """Reduce the lane (last) axis of a (TB, R) tile, keepdims=True."""

    def kernel(x_ref, o_ref):
        x = x_ref[...].astype(acc_dt)
        res = _reduce(x, function, axis=-1)
        if function == "mean":
            res = res * inv_r
        o_ref[...] = res.astype(o_ref.dtype)

    return kernel


def _make_lane_acc_kernel(function: str, inv_r: float, init_val):
    """Reduce the lane axis of a (TB, TR) tile with an R-resident accumulator."""

    def kernel(x_ref, o_ref, acc_ref):
        r = pl.program_id(1)

        @pl.when(r == 0)
        def _():
            acc_ref[...] = jnp.full(acc_ref.shape, init_val, acc_ref.dtype)

        x = x_ref[...].astype(acc_ref.dtype)
        acc_ref[...] = _combine(acc_ref[...], _reduce(x, function, axis=-1),
                                function)

        @pl.when(r == pl.num_programs(1) - 1)
        def _():
            res = acc_ref[...]
            if function == "mean":
                res = res * inv_r
            o_ref[...] = res.astype(o_ref.dtype)

    return kernel


# --------------------------------------------------------------------------- #
# Public entry point                                                           #
# --------------------------------------------------------------------------- #
@functools.partial(jax.jit, static_argnames=("function", "axis"))
def symmetric(x, function: str, axis: int):
    """JAX/Pallas equivalent of Symmetric(function, axis).forward(x)."""
    if function not in ("sum", "mean", "min", "max"):
        raise ValueError(f"unsupported function: {function}")

    ndim = x.ndim
    axis = axis % ndim
    shape = x.shape
    dsize = x.dtype.itemsize
    acc_dt = _acc_dtype(x.dtype)
    R = shape[axis]
    inv_r = 1.0 / R
    init_val = _init_value(function, acc_dt)

    # ------------------------------------------------------------------ #
    # Case A: reduce the last axis -> lane (XLU) reduce on a (B, R) view. #
    # ------------------------------------------------------------------ #
    if axis == ndim - 1:
        B = int(np.prod(shape[:-1]))
        x2 = x.reshape(B, R)  # pure row-major view, no copy

        # Tile R (lane axis) only if a single row would blow the block budget
        # and a multiple-of-128 divisor exists; otherwise keep the full extent.
        row_bytes = max(1, R * dsize)
        if row_bytes > _TARGET_BLOCK_BYTES:
            cap_r = max(128, _TARGET_BLOCK_BYTES // dsize)
            TR = _largest_mult128_divisor_leq(R, cap_r) or R
        else:
            TR = R
        nr = R // TR

        # Batch rows per step sized to the block budget (second-to-last dim
        # must be a multiple of 8 or the full extent).
        cap_b = max(1, _TARGET_BLOCK_BYTES // max(1, TR * dsize))
        if B <= cap_b:
            TB = B
        else:
            TB = _largest_mult8_divisor_leq(B, cap_b) or B
        nb = B // TB

        if nr == 1:
            out2 = pl.pallas_call(
                _make_lane_direct_kernel(function, inv_r, acc_dt),
                out_shape=jax.ShapeDtypeStruct((B, 1), x.dtype),
                grid=(nb,),
                in_specs=[pl.BlockSpec((TB, R), lambda b: (b, 0))],
                out_specs=pl.BlockSpec((TB, 1), lambda b: (b, 0)),
                compiler_params=pltpu.CompilerParams(
                    dimension_semantics=("parallel",)),
            )(x2)
        else:
            out2 = pl.pallas_call(
                _make_lane_acc_kernel(function, inv_r, init_val),
                out_shape=jax.ShapeDtypeStruct((B, 1), x.dtype),
                grid=(nb, nr),
                in_specs=[pl.BlockSpec((TB, TR), lambda b, r: (b, r))],
                out_specs=pl.BlockSpec((TB, 1), lambda b, r: (b, 0)),
                scratch_shapes=[pltpu.VMEM((TB, 1), acc_dt)],
                compiler_params=pltpu.CompilerParams(
                    dimension_semantics=("parallel", "arbitrary")),
            )(x2)
        return out2.reshape(shape[:-1] + (1,))

    # ------------------------------------------------------------------ #
    # Case B: reduce a non-last axis -> sublane reduce on a (B, R, L) view #
    # ------------------------------------------------------------------ #
    B = int(np.prod(shape[:axis]))
    L = int(np.prod(shape[axis + 1:]))
    x3 = x.reshape(B, R, L)  # pure row-major view, no transpose copy

    # L (lane) tiling: keep full extent unless L is a large multiple of 128.
    if L > 512 and L % 128 == 0:
        TL = 128 * _largest_divisor_leq(L // 128, 4)
    else:
        TL = L
    nl = L // TL

    # R (reduction) tiling: divisor of R, multiple of 8, innermost grid axis.
    row_bytes = max(1, TL * dsize)
    if R * row_bytes <= _TARGET_BLOCK_BYTES:
        TR = R
    else:
        cap_r = max(1, _TARGET_BLOCK_BYTES // row_bytes)
        TR = _largest_mult8_divisor_leq(R, cap_r) or R
    nr = R // TR

    # Batch tiling: pack as many rows per step as fit the block budget, but
    # keep >= 2 parallel blocks when possible (v7x has 2 TensorCores/chip).
    block_bytes = max(1, TR * TL * dsize)
    cap_b = max(1, _TARGET_BLOCK_BYTES // block_bytes)
    if B >= 2:
        cap_b = min(cap_b, max(1, B // 2))
    TB = _largest_divisor_leq(B, cap_b)
    nb = B // TB

    if nr == 1:
        # Whole reduction fits in one block: scratch-free direct kernel.
        out3 = pl.pallas_call(
            _make_sublane_direct_kernel(function, inv_r, acc_dt),
            out_shape=jax.ShapeDtypeStruct((B, 1, L), x.dtype),
            grid=(nb, nl),
            in_specs=[pl.BlockSpec((TB, R, TL), lambda b, l: (b, 0, l))],
            out_specs=pl.BlockSpec((TB, 1, TL), lambda b, l: (b, 0, l)),
            compiler_params=pltpu.CompilerParams(
                dimension_semantics=("parallel", "parallel")),
        )(x3)
    else:
        out3 = pl.pallas_call(
            _make_sublane_acc_kernel(function, inv_r, init_val),
            out_shape=jax.ShapeDtypeStruct((B, 1, L), x.dtype),
            grid=(nb, nl, nr),
            in_specs=[pl.BlockSpec((TB, TR, TL), lambda b, l, r: (b, r, l))],
            out_specs=pl.BlockSpec((TB, 1, TL), lambda b, l, r: (b, 0, l)),
            scratch_shapes=[pltpu.VMEM((TB, 1, TL), acc_dt)],
            compiler_params=pltpu.CompilerParams(
                dimension_semantics=("parallel", "parallel", "arbitrary")),
        )(x3)

    return out3.reshape(shape[:axis] + (1,) + shape[axis + 1:])


if __name__ == "__main__":
    key = jax.random.PRNGKey(0)
    # NCHW input, small shapes: batch=2, channels=4, spatial=16x16
    x = jax.random.normal(key, (2, 4, 16, 16), dtype=jnp.float32)

    # All four summary statistics over the H axis (axis=2, keepdim=True).
    refs_h = {
        "sum": jnp.sum(x, axis=2, keepdims=True),
        "mean": jnp.mean(x, axis=2, keepdims=True),
        "min": jnp.min(x, axis=2, keepdims=True),
        "max": jnp.max(x, axis=2, keepdims=True),
    }
    for fn in ("sum", "mean", "min", "max"):
        out = symmetric(x, fn, 2)
        jax.block_until_ready(out)
        assert out.shape == (2, 4, 1, 16), out.shape
        np.testing.assert_allclose(np.asarray(out), np.asarray(refs_h[fn]),
                                   rtol=1e-5, atol=1e-5)

    # Reduction over the channel axis (axis=1) — exercises leading-axis path.
    out_c = symmetric(x, "mean", 1)
    jax.block_until_ready(out_c)
    assert out_c.shape == (2, 1, 16, 16), out_c.shape
    np.testing.assert_allclose(np.asarray(out_c),
                               np.asarray(jnp.mean(x, axis=1, keepdims=True)),
                               rtol=1e-5, atol=1e-5)

    # Reduction over the last axis (axis=3) — exercises the lane-reduce path.
    out_w = symmetric(x, "max", 3)
    jax.block_until_ready(out_w)
    assert out_w.shape == (2, 4, 16, 1), out_w.shape
    np.testing.assert_allclose(np.asarray(out_w),
                               np.asarray(jnp.max(x, axis=3, keepdims=True)),
                               rtol=1e-5, atol=1e-5)

    # Negative axis normalization (axis=-2 == axis 2).
    out_n = symmetric(x, "sum", -2)
    jax.block_until_ready(out_n)
    assert out_n.shape == (2, 4, 1, 16), out_n.shape
    np.testing.assert_allclose(np.asarray(out_n), np.asarray(refs_h["sum"]),
                               rtol=1e-5, atol=1e-5)

    print("KERNEL_OK")
</pallas_src>

<mosaic_0001>
module attributes {stable_mosaic.version = 11 : i64} {
  func.func @kernel(%arg0: i32, %arg1: i32, %arg2: memref<4x16x16xf32, #tpu.memory_space<vmem>>, %arg3: memref<4x1x16xf32, #tpu.memory_space<vmem>>) attributes {dimension_semantics = [#tpu.dimension_semantics<parallel>, #tpu.dimension_semantics<parallel>], iteration_bounds = array<i64: 2, 1>, scalar_prefetch = 0 : i64, scratch_operands = 0 : i64, tpu.core_type = #tpu.core_type<tc>, window_params = [{transform_indices = @transform_0, window_bounds = array<i64: 4, 16, 16>}, {transform_indices = @transform_1, window_bounds = array<i64: 4, 1, 16>}]} {
    %c0 = arith.constant 0 : index
    %c0_0 = arith.constant 0 : index
    %c0_1 = arith.constant 0 : index
    %0 = vector.load %arg2[%c0, %c0_0, %c0_1] : memref<4x16x16xf32, #tpu.memory_space<vmem>>, vector<4x16x16xf32>
    %cst = arith.constant dense<0.000000e+00> : vector<4x16xf32>
    %1 = vector.multi_reduction <add>, %0, %cst [1] : vector<4x16x16xf32> to vector<4x16xf32>
    %2 = vector.shape_cast %1 : vector<4x16xf32> to vector<4x1x16xf32>
    %c0_2 = arith.constant 0 : index
    %c0_3 = arith.constant 0 : index
    %c0_4 = arith.constant 0 : index
    %3 = vector.load %arg3[%c0_2, %c0_3, %c0_4] : memref<4x1x16xf32, #tpu.memory_space<vmem>>, vector<4x1x16xf32>
    tpu.vector_store %arg3[%c0_2, %c0_3, %c0_4], %2 {strides = array<i32>} : memref<4x1x16xf32, #tpu.memory_space<vmem>>, vector<4x1x16xf32>,
    return
  }
  func.func @transform_0(%arg0: i32, %arg1: i32) -> (i32, i32, i32) {
    %c0_i32 = arith.constant 0 : i32
    %c0_i32_0 = arith.constant 0 : i32
    return %arg0, %c0_i32, %arg1 : i32, i32, i32
  }
  func.func @transform_1(%arg0: i32, %arg1: i32) -> (i32, i32, i32) {
    %c0_i32 = arith.constant 0 : i32
    %c0_i32_0 = arith.constant 0 : i32
    return %arg0, %c0_i32, %arg1 : i32, i32, i32
  }
}

</mosaic_0001>

<bundles_post_ra>
// kernel: symmetric.1
= control target key start
LH: loop header
LB: loop body
LE: loop exit
PB: predicated region body
PF: predicated region fallthrough
CT: control target
= control target key end

     0   :  { %6 = vsyncpa [#allocation3], 0  ;;  %s651_s0 = inlined_call_operand.hbm [shape: f32[8,16,16], index: 0, kind: input, shape index: {}]   ;;  %s652_s1 = inlined_call_operand.hbm [shape: f32[8,1,16], index: 1, kind: output, shape index: {}]  }
   0x1   :  { %8 = vsyncpa [#allocation3 + $0x1], 0 }
   0x2   :  { %9 = vsyncpa [#allocation4], 0 }
   0x3   :  { %11 = vsyncpa [#allocation4 + $0x1], 0  ;;  %s518_s6 = smov 0   ;;  %s520_s7 = smov 0  }
   0x4   :  { %s522_s8 = smov 0   ;;  %s524_s9 = smov 0  }
   0x5   :  { %s526_s10 = smov 0   ;;  %s528_s11 = smov 0  }
   0x6 LB: > { %s307_s12 = sadd.s32 4294967295, %s502_s11   ;;  %s308_s13 = sadd.s32 4294967294, %s502_s11   ;;  %s502_s11 = sphi %s528_s11, %s17_s11   ;;  %s498_s10 = sphi %s526_s10, %s661_s10   ;;  %s494_s9 = sphi %s524_s9, %s660_s9   ;;  %s490_s8 = sphi %s522_s8, %s659_s8   ;;  %s486_s7 = sphi %s520_s7, %s658_s7   ;;  %s482_s6 = sphi %s518_s6, %s657_s6  }
   0x7   : > { %s29_s14 = sadd.s32 1, %s498_s10  ;;  %s38_s15 = sadd.s32 1, %s490_s8 }
   0x8   : > { %p31_p0 = scmp.ge.s32.totalorder %s29_s14, 2  ;;  %p45_p1 = scmp.ne.s32.totalorder %s490_s8, %s486_s7 }
   0x9   : > { %p46_p2 = scmp.eq.s32.totalorder %s502_s11, 0  ;;  %p51_p3 = scmp.ne.s32.totalorder %s486_s7, %s482_s6 }
   0xa   : > { %s663_s14 = smov (%p31_p0, %s29_s14), 0  ;;  %p52_p5 = scmp.eq.s32.totalorder %s307_s12, 0 }
   0xb   : > { %p559_p4 = por %p46_p2, %p45_p1  ;;  %s33_s17 = ssub.s32 %s498_s10, %s663_s14 }
   0xc   : > { %p77_p6 = scmp.eq.s32.totalorder %s307_s12, 1  ;;  %p36_p7 = scmp.eq.s32.totalorder %s33_s17, 0 }
   0xd   : > { %p565_p8 = por %p52_p5, %p51_p3  ;;  %p83_p10 = scmp.eq.s32.totalorder %s308_s13, 1 }
   0xe   : > { %p569_p9 = por %p77_p6, %p45_p1  ;;  %p310_p12 = scmp.ge.s32.totalorder %s502_s11, 2 }
   0xf   : > { %s574_s20 = scalar_select %p36_p7, %s490_s8, %s38_s15  }
  0x10   : > { %p576_p11 = por %p83_p10, %p51_p3  ;;  %p336_p13 = scmp.lt.s32.totalorder %s502_s11, 2 }
  0x11   : > { %s103_s22 = sand.u32 1, %s490_s8   ;;  %s323_s24 = sshll.u32 %s498_s10, 6 }
  0x12   : > { %s311_s23 = sshll.u32 %s103_s22, 6  ;;  %s114_s27 = scalar_lea.hbm %s651_s0, %s323_s24 }
  0x13   : > { %s107_s28 = scalar_lea.vmem [#allocation2], %s311_s23  ;;  %s115_s30 = sshll.u32 %s114_s27, 4  ;;  %s116_s30 = int_to_ptr.hbm [resolvable:$true] %s115_s30 }
  0x14   : > { %s117_s29 = sshll.u32 %s107_s28, 4  ;;  %p329_p0 = pnand %p336_p13, %p559_p4  ;;  %s118_s29 = int_to_ptr.vmem [resolvable:$true] %s117_s29 }
  0x15   : > { %p315_p1 = scmp.ge.s32.totalorder %s502_s11, 1  ;;  %s104_s2 = scalar_lea.sflag [#allocation3], %s103_s22 }
  0x16   : > { %s504_s3 = smov 128   ;;  %s505_s4 = smov 8  }
  0x17   : > { %331 = dma.hbm_to_vmem [thread:$0]  (!%p329_p0), %s116_s30, 1024, %s118_s29, %s104_s2, %s504_s3, %s504_s3, %s505_s4  }
  0x18   : > { %p125_p2 = scmp.lt.s32.totalorder %s502_s11, 3 }
  0x1a   : > { %p126_p3 = pnand %p315_p1, %p125_p2 }
  0x1b   : > { %s592_s5 = sand.u32 (!%p126_p3), 1, %s486_s7  }
  0x1c   : > { %129 = sbr.rel (%p126_p3) target bundleno = 57 (0x39), region = 24  ;;  %s316_s12 = sshll.u32 (!%p126_p3), %s592_s5, 6 }
  0x1d   : > { %s132_s13 = scalar_lea.sflag (!%p126_p3), [#allocation3], %s592_s5  ;;  %s135_s15 = scalar_lea.vmem (!%p126_p3), [#allocation2], %s316_s12 }
  0x21   : > { %473 = dma.done.wait (%p565_p8), %s132_s13, 1024  }
  0x22   : > { %475 = vsyncadd (%p565_p8), %s132_s13, 4294966272  ;;  %vm165_vm0 = vcmask 130048   ;;  %v157_v0 = vld [vmem:[%s135_s15] sm:$0xff]  ;;  %v158_v1 = vld [vmem:[%s135_s15 + $0x8] sm:$0xff]  ;;  %s317_s16 = sshll.u32 %s592_s5, 2  ;;  %s319_s17 = sshll.u32 %s494_s9, 2 }
  0x23   : > { %v159_v2 = vld [vmem:[%s135_s15 + $0x10] sm:$0xff]  ;;  %v166_v3 = vsel %vm165_vm0, %v157_v0, 0.0  ;;  %v167_v4 = vsel %vm165_vm0, %v158_v1, 0.0  ;;  %v160_v5 = vld [vmem:[%s135_s15 + $0x18] sm:$0xff]  ;;  %v161_v7 = vld [vmem:[%s135_s15 + $0x20] sm:$0xff]  ;;  %s219_s23 = scalar_lea.hbm %s652_s1, %s319_s17  ;;  %vm202_vm1 = vcmask 122880  }
  0x24   : > { %v175_v6 = vsel %vm165_vm0, %v159_v2, 0.0  ;;  %v162_v8 = vld [vmem:[%s135_s15 + $0x28] sm:$0xff]  ;;  %v168_v9 = vadd.f32 %v167_v4, %v166_v3  ;;  %v176_v10 = vsel %vm165_vm0, %v160_v5, 0.0  ;;  %v184_v11 = vsel %vm165_vm0, %v161_v7, 0.0  ;;  %v163_v13 = vld [vmem:[%s135_s15 + $0x30] sm:$0xff]  ;;  %v164_v14 = vld [vmem:[%s135_s15 + $0x38] sm:$0xff] }
  0x25   : > { %v185_v12 = vsel %vm165_vm0, %v162_v8, 0.0  ;;  %v177_v15 = vadd.f32 %v176_v10, %v175_v6  ;;  %v193_v17 = vsel %vm165_vm0, %v163_v13, 0.0  ;;  %v194_v18 = vsel %vm165_vm0, %v164_v14, 0.0  ;;  %s154_s24 = scalar_lea.vmem [#allocation5], %s317_s16  ;;  %s222_s9 = sshll.u32 %s219_s23, 4  ;;  %s223_s9 = int_to_ptr.hbm [resolvable:$true] %s222_s9 }
  0x26   : > { %v186_v16 = vadd.f32 %v185_v12, %v184_v11  ;;  %v169_v19 = vrot.slane %v168_v9, 4  ;;  %v195_v20 = vadd.f32 %v194_v18, %v193_v17  ;;  %s220_s25 = sshll.u32 %s154_s24, 4  ;;  %s208_s26 = scalar_lea.sflag [#allocation4], %s592_s5  ;;  %s221_s25 = int_to_ptr.vmem [resolvable:$true] %s220_s25 }
  0x27   : > { %v178_v21 = vrot.slane %v177_v15, 4  ;;  %s434_s27 = sshra.s32 %s223_s9, 4  ;;  %s440_s2 = scalar_lea.hbm %s652_s1, 8  ;;  %s435_s27 = int_to_ptr.hbm [resolvable:$true] %s434_s27 }
  0x28   : > { %v187_v22 = vrot.slane %v186_v16, 4  ;;  %v170_v23 = vadd.f32 %v169_v19, %v168_v9  ;;  %v196_v24 = vrot.slane %v195_v20, 4  ;;  %s436_s28 = scalar_lea.hbm %s435_s27, 4  ;;  %p441_p7 = scmp.lt.s32.totalorder %s435_s27, %s652_s1 }
  0x29   : > { %v179_v25 = vadd.f32 %v178_v21, %v177_v15  ;;  %p437_p4 = scmp.ne.s32.totalorder %s435_s27, %s436_s28  ;;  %p442_p8 = scmp.lt.s32.totalorder %s440_s2, %s436_s28 }
  0x2a   : > { %v188_v26 = vadd.f32 %v187_v22, %v186_v16  ;;  %v171_v27 = vrot.slane %v170_v23, 2  ;;  %v197_v28 = vadd.f32 %v196_v24, %v195_v20 }
  0x2b   : > { %v180_v29 = vrot.slane %v179_v25, 2  ;;  %p438_p5 = pnand %p437_p4, %p569_p9  ;;  %p443_p10 = por %p442_p8, %p441_p7 }
  0x2c   : > { %v189_v30 = vrot.slane %v188_v26, 2  ;;  %v172_v31 = vadd.f32 %v171_v27, %v170_v23  ;;  %v198_v32 = vrot.slane %v197_v28, 2 }
  0x2d   : > { %v181_v33 = vadd.f32 %v180_v29, %v179_v25  ;;  %p439_p6 = pneg %p438_p5 }
  0x2e   : > { %v190_v34 = vadd.f32 %v189_v30, %v188_v26  ;;  %v173_v35 = vrot.slane %v172_v31, 1  ;;  %v199_v36 = vadd.f32 %v198_v32, %v197_v28 }
  0x2f   : > { %v182_v37 = vrot.slane %v181_v33, 1  ;;  %p444_p13 = pnand %p443_p10, %p439_p6 }
  0x30   : > { %v191_v38 = vrot.slane %v190_v34, 1  ;;  %v174_v39 = vadd.f32 %v173_v35, %v172_v31  ;;  %v200_v40 = vrot.slane %v199_v36, 1 }
  0x31   : > { %v183_v41 = vadd.f32 %v182_v37, %v181_v33 }
  0x32   : > { %v192_v42 = vadd.f32 %v191_v38, %v190_v34  ;;  %203 = vst.msk [vmem:[%s154_s24] sm:$0x1] %vm202_vm1, %v174_v39  ;;  %v201_v43 = vadd.f32 %v200_v40, %v199_v36 }
  0x33   : > { %204 = vst.msk [vmem:[%s154_s24 + $0x1] sm:$0x1] %vm202_vm1, %v183_v41 }
  0x34   : > { %205 = vst.msk [vmem:[%s154_s24 + $0x2] sm:$0x1] %vm202_vm1, %v192_v42 }
  0x35   : > { %206 = vst.msk [vmem:[%s154_s24 + $0x3] sm:$0x1] %vm202_vm1, %v201_v43 }
  0x36   : > { %447 = shalt.err (!%p444_p13)
}
  0x37   : > { %s506_s5 = smov 16   ;;  %s507_s12 = smov 1  }
  0x38   : > { %326 = dma.vmem_to_hbm [thread:$0]  (%p569_p9), %s221_s25, 64, %s223_s9, %s208_s26, %s506_s5, %s506_s5, %s507_s12  }
  0x39 PF: > { %s237_s13 = sand.u32 1, %s482_s6   ;;  %p333_p0 = pnand %p310_p12, %p576_p11 }
  0x3a   : > { %s238_s15 = scalar_lea.sflag [#allocation4], %s237_s13 }
  0x3b   : > { %p334_p1 = pneg %p333_p0 }
  0x3d   : > { %477 = dma.done.wait (%p334_p1), %s238_s15, 64  }
  0x3e   : > { %479 = vsyncadd (%p334_p1), %s238_s15, 4294967232  ;;  %s17_s11 = sadd.s32 1, %s502_s11   ;;  %s657_s6 = smov %s486_s7 }
  0x3f   : > { %p14_p2 = scmp.ge.s32.totalorder %s17_s11, 4   ;;  %s658_s7 = smov %s490_s8 }
  0x40   : > { %s659_s8 = smov %s574_s20  ;;  %s660_s9 = smov %s498_s10 }
  0x41   : > { %s661_s10 = smov %s663_s14  ;;  %16 = sbr.rel (!%p14_p2) target bundleno = 6 (0x6), region = 69 }
  0x46   :  { %244 = vsyncpa [#allocation3], 1 }
  0x47   :  { %246 = vsyncpa [#allocation3 + $0x1], 1 }
  0x48   :  { %247 = vsyncpa [#allocation4], 1 }
  0x49   :  { %249 = vsyncpa [#allocation4 + $0x1], 1 }

</bundles_post_ra>
